<compile_context>
chip_gen: v7x
topology: tpu7x:2x2x1
jax: 0.10.0
libtpu: 0.0.40
codegen_flags: <defaults>
</compile_context>

<pallas_src>
import math

import jax
import jax.numpy as jnp
import numpy as np
from jax.experimental import pallas as pl
from jax.experimental.pallas import tpu as pltpu


# ----------------------------- kernels ------------------------------------ #

def _inproj_kernel(x_ref, w_in_ref, b_in_ref, w0_ref, inp_ref, hw0_ref):
    # inProj: inp = x @ W_in + b_in (per row tile)
    inp = jnp.dot(x_ref[...], w_in_ref[...],
                  preferred_element_type=jnp.float32) + b_in_ref[...]
    inp_ref[...] = inp
    # first layer's (h W_0), produced here so the layer kernel only streams adj
    hw0_ref[...] = jnp.dot(inp, w0_ref[...], preferred_element_type=jnp.float32)


def _layer_kernel(sft_ref, adj_ref, hw_ref, inp_ref, b_ref, w_next_ref,
                  acc_in_ref, hw_next_ref, acc_out_ref, psum_ref):
    k = pl.program_id(1)

    @pl.when(k == 0)
    def _():
        psum_ref[...] = jnp.zeros_like(psum_ref)

    # dominant cost: Â[m, k] @ (h W)[k], accumulated over neighbor tiles
    psum_ref[...] += jnp.dot(adj_ref[...], hw_ref[...],
                             preferred_element_type=jnp.float32)

    @pl.when(k == pl.num_programs(1) - 1)
    def _():
        # BN already folded into b_ref / the conv weight: bias + ReLU + residual
        h = jnp.maximum(psum_ref[...] + b_ref[...], 0.0) + 0.2 * inp_ref[...]
        # weighted layer aggregation (softmax coefficient via SMEM scalar)
        acc_out_ref[...] = acc_in_ref[...] + sft_ref[0] * h
        # (h W) for the next layer so the next call only streams adj tiles
        hw_next_ref[...] = jnp.dot(h, w_next_ref[...],
                                   preferred_element_type=jnp.float32)


def _final_kernel(acc_ref, w_out_ref, b_out_ref, o_ref):
    out = jnp.dot(acc_ref[...], w_out_ref[...],
                  preferred_element_type=jnp.float32) + b_out_ref[...]
    # padded output lanes carry bias -1e30 -> exp() == 0, so the log-softmax
    # over the full 128-lane tile equals the log-softmax over the real classes
    m = jnp.max(out, axis=-1, keepdims=True)
    z = out - m
    lse = jnp.log(jnp.sum(jnp.exp(z), axis=-1, keepdims=True))
    o_ref[...] = (z - lse).astype(o_ref.dtype)


# ----------------------------- wrapper ------------------------------------ #

def _round_up(x, m):
    return ((x + m - 1) // m) * m


def _pad2(a, rows, cols):
    return jnp.pad(a, ((0, rows - a.shape[0]), (0, cols - a.shape[1])))


def gcn_forward(x, adj, params, *, tile_m=128, tile_k=128, eps=1e-5,
                vmem_limit_bytes=64 * 1024 * 1024):
    N, Fin = x.shape
    H = params["w_in"].shape[1]
    L = params["w_conv"].shape[0]
    out_c = params["w_out"].shape[1]

    Fp = _round_up(Fin, 128)
    Hp = _round_up(H, 128)
    Op = _round_up(out_c, 128)
    Np = _round_up(N, math.lcm(tile_m, tile_k))
    f32 = jnp.float32

    # -------- wrapper-side precompute (free; cuts per-layer VPU/DMA work) ----
    # fold eval-mode BatchNorm into the conv weight / bias (exact)
    scale = params["bn_g"] * jax.lax.rsqrt(params["bn_v"] + eps)           # [L,H]
    w_conv_f = params["w_conv"] * scale[:, None, :]                        # [L,H,H]
    b_conv_f = (params["b_conv"] - params["bn_m"]) * scale + params["bn_b"]

    # softmax over the learnable per-layer mixing weights -> per-layer scalars
    sft = jax.nn.softmax(params["layer_w"].reshape(-1)).astype(f32)        # [L]

    # -------- lane/sublane padding (exact) -----------------------------------
    x_p = _pad2(x.astype(f32), Np, Fp)
    adj_p = _pad2(adj.astype(f32), Np, Np)
    w_in_p = _pad2(params["w_in"].astype(f32), Fp, Hp)
    b_in_p = _pad2(params["b_in"].astype(f32).reshape(1, H), 1, Hp)
    w_conv_p = jnp.stack([_pad2(w_conv_f[l].astype(f32), Hp, Hp)
                          for l in range(L)])
    b_conv_p = jnp.stack([_pad2(b_conv_f[l].astype(f32).reshape(1, H), 1, Hp)
                          for l in range(L)])
    w_out_p = _pad2(params["w_out"].astype(f32), Hp, Op)
    b_out_p = jnp.full((1, Op), -1e30, f32).at[:, :out_c].set(
        params["b_out"].astype(f32).reshape(1, out_c))

    n_m = Np // tile_m
    n_k = Np // tile_k

    cparams_1d = pltpu.CompilerParams(
        dimension_semantics=("parallel",), vmem_limit_bytes=vmem_limit_bytes)
    cparams_2d = pltpu.CompilerParams(
        dimension_semantics=("parallel", "arbitrary"),
        vmem_limit_bytes=vmem_limit_bytes)

    # -------- inProj (+ first layer's h @ W_0) --------------------------------
    inp, hw = pl.pallas_call(
        _inproj_kernel,
        grid=(n_m,),
        in_specs=[
            pl.BlockSpec((tile_m, Fp), lambda m: (m, 0)),
            pl.BlockSpec((Fp, Hp), lambda m: (0, 0)),
            pl.BlockSpec((1, Hp), lambda m: (0, 0)),
            pl.BlockSpec((Hp, Hp), lambda m: (0, 0)),
        ],
        out_specs=[
            pl.BlockSpec((tile_m, Hp), lambda m: (m, 0)),
            pl.BlockSpec((tile_m, Hp), lambda m: (m, 0)),
        ],
        out_shape=[jax.ShapeDtypeStruct((Np, Hp), f32),
                   jax.ShapeDtypeStruct((Np, Hp), f32)],
        compiler_params=cparams_1d,
    )(x_p, w_in_p, b_in_p, w_conv_p[0])

    acc = jnp.zeros((Np, Hp), f32)

    # -------- GCNConv layers: Â @ (h W) tiled over (row, neighbor) blocks -----
    layer_call = pl.pallas_call(
        _layer_kernel,
        grid=(n_m, n_k),
        in_specs=[
            pl.BlockSpec(memory_space=pltpu.MemorySpace.SMEM),     # sft_l scalar
            pl.BlockSpec((tile_m, tile_k), lambda m, k: (m, k)),   # adj tile
            pl.BlockSpec((tile_k, Hp), lambda m, k: (k, 0)),       # (h W) slab
            pl.BlockSpec((tile_m, Hp), lambda m, k: (m, 0)),       # inp residual
            pl.BlockSpec((1, Hp), lambda m, k: (0, 0)),            # folded bias
            pl.BlockSpec((Hp, Hp), lambda m, k: (0, 0)),           # next-layer W
            pl.BlockSpec((tile_m, Hp), lambda m, k: (m, 0)),       # acc in
        ],
        out_specs=[
            pl.BlockSpec((tile_m, Hp), lambda m, k: (m, 0)),       # (h W) next
            pl.BlockSpec((tile_m, Hp), lambda m, k: (m, 0)),       # acc out
        ],
        out_shape=[jax.ShapeDtypeStruct((Np, Hp), f32),
                   jax.ShapeDtypeStruct((Np, Hp), f32)],
        scratch_shapes=[pltpu.VMEM((tile_m, Hp), f32)],
        input_output_aliases={6: 1},                               # carry acc in place
        compiler_params=cparams_2d,
    )

    for l in range(L):
        w_next = w_conv_p[(l + 1) % L]   # last layer's hw_next output is unused
        hw, acc = layer_call(sft[l].reshape(1), adj_p, hw, inp,
                             b_conv_p[l], w_next, acc)

    # -------- final Linear + log_softmax ---------------------------------------
    out_p = pl.pallas_call(
        _final_kernel,
        grid=(n_m,),
        in_specs=[
            pl.BlockSpec((tile_m, Hp), lambda m: (m, 0)),
            pl.BlockSpec((Hp, Op), lambda m: (0, 0)),
            pl.BlockSpec((1, Op), lambda m: (0, 0)),
        ],
        out_specs=pl.BlockSpec((tile_m, Op), lambda m: (m, 0)),
        out_shape=jax.ShapeDtypeStruct((Np, Op), f32),
        compiler_params=cparams_1d,
    )(acc, w_out_p, b_out_p)

    return out_p[:N, :out_c]


# ----------------------------- reference / data ---------------------------- #

def gcn_reference(x, adj, p):
    """Pure-JAX reference mirroring GCN.forward (eval mode)."""
    h = x @ p["w_in"] + p["b_in"]
    inp = h
    sft = jax.nn.softmax(p["layer_w"][0])
    acc = jnp.zeros_like(h)
    for i in range(p["w_conv"].shape[0]):
        h2 = adj @ (h @ p["w_conv"][i]) + p["b_conv"][i]
        h2 = (h2 - p["bn_m"][i]) / jnp.sqrt(p["bn_v"][i] + 1e-5) * p["bn_g"][i] + p["bn_b"][i]
        h2 = jnp.maximum(h2, 0.0)
        h = h2 + 0.2 * inp
        acc = acc + h * sft[i]
    out = acc @ p["w_out"] + p["b_out"]
    return jax.nn.log_softmax(out, axis=-1)


def make_params(key, in_channels, hidden, out_channels, num_layers):
    ks = jax.random.split(key, 12)
    return {
        "w_in":   jax.random.normal(ks[0], (in_channels, hidden), jnp.float32) * 0.1,
        "b_in":   jax.random.normal(ks[1], (1, hidden), jnp.float32) * 0.1,
        "w_conv": jax.random.normal(ks[2], (num_layers, hidden, hidden), jnp.float32) * 0.1,
        "b_conv": jax.random.normal(ks[3], (num_layers, hidden), jnp.float32) * 0.1,
        "bn_g":   1.0 + 0.1 * jax.random.normal(ks[4], (num_layers, hidden), jnp.float32),
        "bn_b":   0.1 * jax.random.normal(ks[5], (num_layers, hidden), jnp.float32),
        "bn_m":   0.1 * jax.random.normal(ks[6], (num_layers, hidden), jnp.float32),
        "bn_v":   1.0 + 0.1 * jax.random.uniform(ks[7], (num_layers, hidden), jnp.float32),
        "layer_w": jax.random.normal(ks[8], (1, num_layers), jnp.float32),
        "w_out":  jax.random.normal(ks[9], (hidden, out_channels), jnp.float32) * 0.1,
        "b_out":  jax.random.normal(ks[10], (1, out_channels), jnp.float32) * 0.1,
    }


def make_normalized_adj(key, n):
    # random undirected graph with self-loops, symmetric normalization
    a = (jax.random.uniform(key, (n, n)) < 0.1).astype(jnp.float32)
    a = jnp.maximum(a, a.T)
    a = a + jnp.eye(n, dtype=jnp.float32)
    deg = jnp.sum(a, axis=1)
    dinv = 1.0 / jnp.sqrt(deg)
    return a * dinv[:, None] * dinv[None, :]


if __name__ == "__main__":
    N, in_channels, hidden, out_channels, num_layers = 500, 32, 32, 16, 3

    key = jax.random.PRNGKey(0)
    kx, kadj, kp = jax.random.split(key, 3)

    x = jax.random.normal(kx, (N, in_channels), jnp.float32)
    adj = make_normalized_adj(kadj, N)
    params = make_params(kp, in_channels, hidden, out_channels, num_layers)

    out = jax.block_until_ready(gcn_forward(x, adj, params))

    with jax.default_matmul_precision("float32"):
        ref = jax.block_until_ready(gcn_reference(x, adj, params))
    np.testing.assert_allclose(np.asarray(out), np.asarray(ref), atol=1e-3, rtol=1e-3)

    print("KERNEL_OK")
</pallas_src>

<mosaic_0001>
module attributes {stable_mosaic.version = 11 : i64} {
  func.func @_inproj_kernel(%arg0: i32, %arg1: memref<128x128xf32, #tpu.memory_space<vmem>>, %arg2: memref<128x128xf32, #tpu.memory_space<vmem>>, %arg3: memref<1x128xf32, #tpu.memory_space<vmem>>, %arg4: memref<128x128xf32, #tpu.memory_space<vmem>>, %arg5: memref<128x128xf32, #tpu.memory_space<vmem>>, %arg6: memref<128x128xf32, #tpu.memory_space<vmem>>) attributes {dimension_semantics = [#tpu.dimension_semantics<parallel>], iteration_bounds = array<i64: 4>, scalar_prefetch = 0 : i64, scratch_operands = 0 : i64, tpu.core_type = #tpu.core_type<tc>, window_params = [{transform_indices = @transform_0, window_bounds = array<i64: 128, 128>}, {pipeline_mode = #tpu.pipeline_mode<synchronous>, transform_indices = @transform_1, window_bounds = array<i64: 128, 128>}, {pipeline_mode = #tpu.pipeline_mode<synchronous>, transform_indices = @transform_2, window_bounds = array<i64: 1, 128>}, {pipeline_mode = #tpu.pipeline_mode<synchronous>, transform_indices = @transform_3, window_bounds = array<i64: 128, 128>}, {transform_indices = @transform_4, window_bounds = array<i64: 128, 128>}, {transform_indices = @transform_5, window_bounds = array<i64: 128, 128>}]} {
    %c0 = arith.constant 0 : index
    %c0_0 = arith.constant 0 : index
    %0 = vector.load %arg1[%c0, %c0_0] : memref<128x128xf32, #tpu.memory_space<vmem>>, vector<128x128xf32>
    %c0_1 = arith.constant 0 : index
    %c0_2 = arith.constant 0 : index
    %1 = vector.load %arg2[%c0_1, %c0_2] : memref<128x128xf32, #tpu.memory_space<vmem>>, vector<128x128xf32>
    %cst = arith.constant dense<0.000000e+00> : vector<128x128xf32>
    %2 = tpu.matmul %0, %1, %cst {dimension_numbers = #tpu.dot_dimension_numbers<[1], [0], [0], [1], [0, 0, 1, 1], [], []>} : vector<128x128xf32>, vector<128x128xf32>, vector<128x128xf32> -> vector<128x128xf32>
    %c0_3 = arith.constant 0 : index
    %c0_4 = arith.constant 0 : index
    %3 = vector.load %arg3[%c0_3, %c0_4] : memref<1x128xf32, #tpu.memory_space<vmem>>, vector<1x128xf32>
    %4 = vector.broadcast %3 : vector<1x128xf32> to vector<128x128xf32>
    %5 = arith.addf %2, %4 : vector<128x128xf32>
    %c0_5 = arith.constant 0 : index
    %c0_6 = arith.constant 0 : index
    %6 = vector.load %arg5[%c0_5, %c0_6] : memref<128x128xf32, #tpu.memory_space<vmem>>, vector<128x128xf32>
    tpu.vector_store %arg5[%c0_5, %c0_6], %5 {strides = array<i32>} : memref<128x128xf32, #tpu.memory_space<vmem>>, vector<128x128xf32>,
    %c0_7 = arith.constant 0 : index
    %c0_8 = arith.constant 0 : index
    %7 = vector.load %arg4[%c0_7, %c0_8] : memref<128x128xf32, #tpu.memory_space<vmem>>, vector<128x128xf32>
    %cst_9 = arith.constant dense<0.000000e+00> : vector<128x128xf32>
    %8 = tpu.matmul %5, %7, %cst_9 {dimension_numbers = #tpu.dot_dimension_numbers<[1], [0], [0], [1], [0, 0, 1, 1], [], []>} : vector<128x128xf32>, vector<128x128xf32>, vector<128x128xf32> -> vector<128x128xf32>
    %c0_10 = arith.constant 0 : index
    %c0_11 = arith.constant 0 : index
    %9 = vector.load %arg6[%c0_10, %c0_11] : memref<128x128xf32, #tpu.memory_space<vmem>>, vector<128x128xf32>
    tpu.vector_store %arg6[%c0_10, %c0_11], %8 {strides = array<i32>} : memref<128x128xf32, #tpu.memory_space<vmem>>, vector<128x128xf32>,
    return
  }
  func.func @transform_0(%arg0: i32) -> (i32, i32) {
    %c0_i32 = arith.constant 0 : i32
    %c0_i32_0 = arith.constant 0 : i32
    return %arg0, %c0_i32 : i32, i32
  }
  func.func @transform_1(%arg0: i32) -> (i32, i32) {
    %c0_i32 = arith.constant 0 : i32
    %c0_i32_0 = arith.constant 0 : i32
    %c0_i32_1 = arith.constant 0 : i32
    return %c0_i32, %c0_i32_0 : i32, i32
  }
  func.func @transform_2(%arg0: i32) -> (i32, i32) {
    %c0_i32 = arith.constant 0 : i32
    %c0_i32_0 = arith.constant 0 : i32
    %c0_i32_1 = arith.constant 0 : i32
    return %c0_i32, %c0_i32_0 : i32, i32
  }
  func.func @transform_3(%arg0: i32) -> (i32, i32) {
    %c0_i32 = arith.constant 0 : i32
    %c0_i32_0 = arith.constant 0 : i32
    %c0_i32_1 = arith.constant 0 : i32
    return %c0_i32, %c0_i32_0 : i32, i32
  }
  func.func @transform_4(%arg0: i32) -> (i32, i32) {
    %c0_i32 = arith.constant 0 : i32
    %c0_i32_0 = arith.constant 0 : i32
    return %arg0, %c0_i32 : i32, i32
  }
  func.func @transform_5(%arg0: i32) -> (i32, i32) {
    %c0_i32 = arith.constant 0 : i32
    %c0_i32_0 = arith.constant 0 : i32
    return %arg0, %c0_i32 : i32, i32
  }
}

</mosaic_0001>

<bundles_post_ra>
// kernel: tpu_custom_call.1
= control target key start
LH: loop header
LB: loop body
LE: loop exit
PB: predicated region body
PF: predicated region fallthrough
CT: control target
= control target key end

     0   :  { %11 = vsyncpa [#allocation3], 0  ;;  %s1830_s0 = inlined_call_operand.hbm [shape: f32[512,128], index: 0, kind: input, shape index: {}]   ;;  %s1831_s1 = inlined_call_operand.hbm [shape: f32[128,128], index: 1, kind: input, shape index: {}]   ;;  %s1832_s2 = inlined_call_operand.hbm [shape: f32[1,128], index: 2, kind: input, shape index: {}]   ;;  %s1833_s3 = inlined_call_operand.hbm [shape: f32[128,128], index: 3, kind: input, shape index: {}]   ;;  %s1834_s4 = inlined_call_operand.hbm [shape: f32[512,128], index: 4, kind: output, shape index: {0}]   ;;  %s1835_s5 = inlined_call_operand.hbm [shape: f32[512,128], index: 5, kind: output, shape index: {1}]  }
   0x1   :  { %13 = vsyncpa [#allocation3 + $0x1], 0 }
   0x2   :  { %14 = vsyncpa [#allocation6], 0 }
   0x3   :  { %15 = vsyncpa [#allocation9], 0 }
   0x4   :  { %16 = vsyncpa [#allocation4], 0 }
   0x5   :  { %18 = vsyncpa [#allocation4 + $0x1], 0 }
   0x6   :  { %19 = vsyncpa [#allocation12], 0 }
   0x7   :  { %21 = vsyncpa [#allocation12 + $0x1], 0  ;;  %s1461_s18 = smov 0   ;;  %s1463_s19 = smov 0  }
   0x8   :  { %s1465_s20 = smov 0   ;;  %s1467_s21 = smov 0  }
   0x9 LB: > { %s1482_s22 = sadd.s32 4294967295, %s1419_s21   ;;  %s845_s23 = sadd.s32 4294967294, %s1419_s21   ;;  %s1419_s21 = sphi %s1467_s21, %s1857_s21   ;;  %s1415_s20 = sphi %s1465_s20, %s1856_s20   ;;  %s1411_s19 = sphi %s1463_s19, %s1855_s19   ;;  %s1407_s18 = sphi %s1461_s18, %s1854_s18  }
   0xa   : > { %p47_p0 = scmp.ne.s32.totalorder %s1411_s19, %s1407_s18  ;;  %p1836_p1 = scmp.eq.s32.totalorder %s1482_s22, 0 }
   0xb   : > { %p140_p3 = scmp.eq.s32.totalorder %s845_s23, 3  ;;  %p846_p5 = scmp.ge.s32.totalorder %s1419_s21, 1 }
   0xc   : > { %p1491_p4 = por %p1836_p1, %p47_p0  ;;  %p173_p7 = scmp.lt.s32.totalorder %s1419_s21, 5 }
   0xd   : > { %p1496_p6 = por %p140_p3, %p47_p0  ;;  %s1421_s27 = smov [#allocation5]  }
   0xe   : > { %s1839_s24 = scalar_select %p1491_p4, 1, 0 }
   0xf   : > { %s1840_s25 = scalar_select %p1496_p6, 1, 0 }
  0x10   : > { %p1501_p8 = pnand %p846_p5, %p173_p7  ;;  %s185_s28 = sshll.u32 %s1421_s27, 4  ;;  %s1505_s28 = int_to_ptr.vmem [resolvable:$true] %s185_s28 }
  0x11   : > { %s1422_s30 = smov [#allocation7]   ;;  %s1423_s7 = smov [#allocation8]  }
  0x12   : > { %s1841_s26 = scalar_select %p1501_p8, 1, 0 }
  0x13   : > { %p1131_p9 = pneg %p1501_p8  ;;  %s199_s6 = sshll.u32 %s1422_s30, 4  ;;  %s1515_s6 = int_to_ptr.vmem [resolvable:$true] %s199_s6 }
  0x14   : > { %s1517_s8 = sshll.u32 %s1423_s7, 4  ;;  %s1199_s11 = scalar_lea.hbm %s1831_s1, 2048  ;;  %s210_s8 = int_to_ptr.vmem [resolvable:$true] %s1517_s8 }
  0x15   : > { %p1511_p10 = pnand %p1131_p9, %p1836_p1  ;;  %p1200_p11 = scmp.ne.s32.totalorder %s1831_s1, %s1199_s11 }
  0x16   : > { %p1206_p3 = scmp.lt.u32.totalorder %s1199_s11, %s1831_s1 }
  0x17   : > { %p1527_p12 = pneg %p1511_p10 }
  0x19   : > { %p1202_p13 = pnand %p1527_p12, %p1200_p11 }
  0x1b   : > { %p1203_p0 = pneg %p1202_p13 }
  0x1d   : > { %p1208_p5 = pnand %p1206_p3, %p1203_p0 }
  0x1f   : > { %1211 = shalt.err (!%p1208_p5)
}
  0x20   : > { %s1212_s17 = scalar_lea.vmem %s1505_s28, 2048  ;;  %p1220_p2 = scmp.lt.s32.totalorder %s1505_s28, %s1505_s28 }
  0x21   : > { %p1213_p7 = scmp.ne.s32.totalorder %s1505_s28, %s1212_s17  ;;  %p1221_p6 = scmp.lt.s32.totalorder %s1212_s17, %s1212_s17 }
  0x23   : > { %p1215_p9 = pnand %p1213_p7, %p1527_p12  ;;  %p1222_p11 = por %p1221_p6, %p1220_p2 }
  0x25   : > { %p1216_p1 = pneg %p1215_p9 }
  0x27   : > { %p1223_p13 = pnand %p1222_p11, %p1216_p1 }
  0x29   : > { %1226 = shalt.err (!%p1223_p13)
}
  0x2a   : > { %s1424_s23 = smov 128   ;;  %s1425_s27 = smov 8  }
  0x2b   : > { %1134 = dma.hbm_to_vmem [thread:$0]  (!%p1511_p10), %s1831_s1, 2048, %s1505_s28, [#allocation6], %s1424_s23, %s1424_s23, %s1425_s27  }
  0x2c   : > { %s1227_s11 = scalar_lea.hbm %s1832_s2, 16 }
  0x2d   : > { %p1228_p1 = scmp.ne.s32.totalorder %s1832_s2, %s1227_s11  ;;  %p1234_p0 = scmp.lt.u32.totalorder %s1227_s11, %s1832_s2 }
  0x2f   : > { %p1230_p2 = pnand %p1228_p1, %p1527_p12 }
  0x31   : > { %p1231_p6 = pneg %p1230_p2 }
  0x33   : > { %p1236_p3 = pnand %p1234_p0, %p1231_p6 }
  0x35   : > { %1239 = shalt.err (!%p1236_p3)
}
  0x36   : > { %s1240_s28 = scalar_lea.vmem %s1515_s6, 16  ;;  %s1247_s17 = scalar_lea.vmem %s1515_s6, 32 }
  0x37   : > { %p1241_p5 = scmp.ne.s32.totalorder %s1515_s6, %s1240_s28  ;;  %p1248_p11 = scmp.lt.s32.totalorder %s1515_s6, %s1515_s6 }
  0x38   : > { %p1249_p13 = scmp.lt.s32.totalorder %s1247_s17, %s1240_s28 }
  0x39   : > { %p1243_p7 = pnand %p1241_p5, %p1527_p12 }
  0x3a   : > { %p1250_p1 = por %p1249_p13, %p1248_p11 }
  0x3b   : > { %p1244_p9 = pneg %p1243_p7 }
  0x3d   : > { %p1251_p2 = pnand %p1250_p1, %p1244_p9 }
  0x3f   : > { %1254 = shalt.err (!%p1251_p2)
}
  0x40   : > { %1137 = dma.hbm_to_vmem [thread:$0]  (!%p1511_p10), %s1832_s2, 16, %s1515_s6, [#allocation6]  }
  0x41   : > { %s1255_s11 = scalar_lea.hbm %s1833_s3, 2048 }
  0x42   : > { %p1256_p6 = scmp.ne.s32.totalorder %s1833_s3, %s1255_s11  ;;  %p1262_p5 = scmp.lt.u32.totalorder %s1255_s11, %s1833_s3 }
  0x44   : > { %p1258_p0 = pnand %p1256_p6, %p1527_p12 }
  0x46   : > { %p1259_p3 = pneg %p1258_p0 }
  0x48   : > { %p1264_p7 = pnand %p1262_p5, %p1259_p3 }
  0x4a   : > { %1267 = shalt.err (!%p1264_p7)
}
  0x4b   : > { %s1268_s28 = scalar_lea.vmem %s210_s8, 2048  ;;  %p1276_p1 = scmp.lt.s32.totalorder %s210_s8, %s210_s8 }
  0x4c   : > { %p1269_p9 = scmp.ne.s32.totalorder %s210_s8, %s1268_s28  ;;  %p1277_p2 = scmp.lt.s32.totalorder %s1268_s28, %s1268_s28 }
  0x4e   : > { %p1271_p11 = pnand %p1269_p9, %p1527_p12  ;;  %p1278_p4 = por %p1277_p2, %p1276_p1 }
  0x50   : > { %p1272_p13 = pneg %p1271_p11 }
  0x52   : > { %p1279_p8 = pnand %p1278_p4, %p1272_p13 }
  0x54   : > { %1282 = shalt.err (!%p1279_p8)
}
  0x55   : > { %1140 = dma.hbm_to_vmem [thread:$0]  (!%p1511_p10), %s1833_s3, 2048, %s210_s8, [#allocation9], %s1424_s23, %s1424_s23, %s1425_s27  }
  0x56   : > { %s1598_s14 = sadd.s32 1, %s1419_s21   ;;  %s34_s30 = sadd.s32 1, %s1415_s20 }
  0x57   : > { %s31_s29 = ssub.s32 %s1419_s21, %s1598_s14  ;;  %p41_p8 = scmp.ne.s32.totalorder %s1415_s20, %s1411_s19 }
  0x58   : > { %p32_p4 = scmp.eq.s32.totalorder %s31_s29, 0  ;;  %p42_p12 = scmp.eq.s32.totalorder %s1419_s21, 0 }
  0x59   : > { %p1155_p6 = scmp.lt.s32.totalorder %s1419_s21, 4  ;;  %p1844_p3 = scmp.eq.s32.totalorder %s1482_s22, 3 }
  0x5a   : > { %s1608_s7 = scalar_select %p32_p4, %s1415_s20, %s34_s30  }
  0x5b   : > { %p43_p0 = por %p42_p12, %p41_p8  ;;  %p1612_p5 = por %p1844_p3, %p41_p8 }
  0x5c   : > { %s223_s10 = sand.u32 1, %s1415_s20   ;;  %s870_s11 = sshll.u32 %s1419_s21, 11 }
  0x5d   : > { %s851_s8 = sshll.u32 %s223_s10, 7  ;;  %s1621_s15 = scalar_lea.hbm %s1830_s0, %s870_s11 }
  0x5e   : > { %s227_s16 = scalar_lea.vmem [#allocation2], %s851_s8  ;;  %p1623_p10 = pnand %p1155_p6, %p43_p0 }
  0x5f   : > { %s234_s28 = sshll.u32 %s227_s16, 4  ;;  %s1629_s17 = scalar_lea.sflag [#allocation3], %s223_s10  ;;  %s1627_s28 = int_to_ptr.vmem [resolvable:$true] %s234_s28 }
  0x60   : > { %s1283_s29 = scalar_lea.hbm %s1621_s15, 2048  ;;  %p1285_p9 = pneg %p1623_p10 }
  0x61   : > { %p1284_p7 = scmp.ne.s32.totalorder %s1621_s15, %s1283_s29  ;;  %s1288_s8 = scalar_lea.hbm %s1830_s0, 8192 }
  0x62   : > { %p1289_p1 = scmp.lt.u32.totalorder %s1621_s15, %s1830_s0  ;;  %p1290_p2 = scmp.lt.u32.totalorder %s1288_s8, %s1283_s29 }
  0x63   : > { %p1286_p11 = pnand %p1285_p9, %p1284_p7  ;;  %p1292_p8 = scmp.lt.u32.totalorder %s1283_s29, %s1621_s15 }
  0x64   : > { %p1291_p4 = por %p1290_p2, %p1289_p1 }
  0x65   : > { %p1287_p13 = pneg %p1286_p11 }
  0x66   : > { %p1293_p12 = por %p1292_p8, %p1291_p4 }
  0x68   : > { %p1294_p6 = pnand %p1293_p12, %p1287_p13 }
  0x6a   : > { %1297 = shalt.err (!%p1294_p6)
}
  0x6b   : > { %s1298_s10 = scalar_lea.vmem %s1627_s28, 2048  ;;  %s1426_s16 = smov [#allocation2]  }
  0x6c   : > { %p1299_p0 = scmp.ne.s32.totalorder %s1627_s28, %s1298_s10  ;;  %s1303_s30 = sshll.u32 %s1426_s16, 4  ;;  %s1304_s30 = int_to_ptr.vmem [resolvable:$false] %s1303_s30 }
  0x6d   : > { %s1305_s11 = scalar_lea.vmem %s1304_s30, 4096  ;;  %p1306_p11 = scmp.lt.s32.totalorder %s1627_s28, %s1304_s30 }
  0x6e   : > { %p1301_p3 = pnand %p1299_p0, %p1285_p9  ;;  %p1307_p1 = scmp.lt.s32.totalorder %s1305_s11, %s1298_s10 }
  0x70   : > { %p1302_p7 = pneg %p1301_p3  ;;  %p1308_p2 = por %p1307_p1, %p1306_p11 }
  0x72   : > { %p1309_p4 = pnand %p1308_p2, %p1302_p7 }
  0x74   : > { %1312 = shalt.err (!%p1309_p4)
}
  0x75   : > { %1144 = dma.hbm_to_vmem [thread:$0]  (!%p1623_p10), %s1621_s15, 2048, %s1627_s28, %s1629_s17, %s1424_s23, %s1424_s23, %s1425_s27  }
  0x76   : > { %p1847_p9 = scmp.ne.s32.totalorder %s1841_s26, 0 }
  0x77   : > { %s1663_s29 = sand.u32 (!%p1847_p9), 1, %s1411_s19   ;;  %p1848_p13 = scmp.ne.s32.totalorder (!%p1847_p9), %s1839_s24, 0 }
  0x78   : > { %246 = sbr.rel (%p1847_p9) target bundleno = 641 (0x281), region = 36  ;;  %s1666_s8 = sshll.u32 (!%p1847_p9), %s1663_s29, 7 }
  0x79   : > { %s249_s6 = scalar_lea.sflag (!%p1847_p9), [#allocation3], %s1663_s29  ;;  %s1670_s12 = scalar_lea.vmem (!%p1847_p9), [#allocation2], %s1666_s8 }
  0x7f   : > { %1386 = dma.done.wait (%p1848_p13), %s249_s6, 2048  }
  0x80   : > { %1388 = vsyncadd (%p1848_p13), %s249_s6, 4294965248  ;;  %p1849_p10 = scmp.eq.s32.totalorder %s1482_s22, 0 }
  0x82   : > { %1390 = dma.done.wait (%p1849_p10), [#allocation6], 2064   ;;  %p1850_p8 = pmov %p1849_p10 }
  0x84   : > { %1392 = vsyncadd (%p1850_p8), [#allocation6], 4294965232  ;;  %p1851_p12 = pmov %p1850_p8 }
  0x85   : > { %p1852_p6 = pmov %p1850_p8 }
  0x86   : > { %1394 = dma.done.wait (%p1851_p12), [#allocation9], 2048  }
  0x87   : > { %1396 = vsyncadd (%p1852_p6), [#allocation9], 4294965248  ;;  %v315_v0 = vld [vmem:[#allocation5] sm:$0xff]  ;;  %v316_v1 = vld [vmem:[#allocation5 + $0x8] sm:$0xff]  ;;  %s1701_s24 = scalar_lea.vmem [#allocation10], %s1666_s8  ;;  %s871_s26 = sshll.u32 %s1482_s22, 11 }
  0x88   : > { %v317_v2 = vld [vmem:[#allocation5 + $0x10] sm:$0xff]  ;;  %v1049_v3 = vpack.c.bf16 %v316_v1, %v315_v0  ;;  %v318_v4 = vld [vmem:[#allocation5 + $0x18] sm:$0xff]  ;;  %v319_v6 = vld [vmem:[#allocation5 + $0x20] sm:$0xff]  ;;  %s695_s23 = sshll.u32 %s1701_s24, 4  ;;  %s1726_s28 = scalar_lea.hbm %s1834_s4, %s871_s26  ;;  %s1728_s23 = int_to_ptr.vmem [resolvable:$true] %s695_s23 }
  0x89   : > { %v1053_v5 = vpack.c.bf16 %v318_v4, %v317_v2  ;;  %v320_v7 = vld [vmem:[#allocation5 + $0x28] sm:$0xff]  ;;  %v299_v9 = vld [vmem:[%s1670_s12] sm:$0xff]  ;;  %v321_v10 = vld [vmem:[#allocation5 + $0x30] sm:$0xff]  ;;  %s677_s17 = scalar_lea.sflag [#allocation4], %s1663_s29  ;;  %s1313_s13 = scalar_lea.vmem %s1728_s23, 2048 }
  0x8a   : > { %1050 = vmatprep.subr.bf16.mxu0 %v1049_v3  ;;  %v1057_v8 = vpack.c.bf16 %v320_v7, %v319_v6  ;;  %v322_v11 = vld [vmem:[#allocation5 + $0x38] sm:$0xff]  ;;  %969 = vmatprep.mubr.f32.mxu0 %v299_v9  ;;  %v323_v13 = vld [vmem:[#allocation5 + $0x40] sm:$0xff]  ;;  %v324_v14 = vld [vmem:[#allocation5 + $0x48] sm:$0xff]  ;;  %p1314_p0 = scmp.ne.s32.totalorder %s1728_s23, %s1313_s13  ;;  %s1427_s10 = smov [#allocation10]  }
  0x8b   : > { %1052 = vmatpush3.bf16.msra.mxu0 %v1049_v3  ;;  %v1061_v12 = vpack.c.bf16 %v322_v11, %v321_v10  ;;  %v499_v15 = vld [vmem:[#allocation8] sm:$0xff]  ;;  %v500_v16 = vld [vmem:[#allocation8 + $0x8] sm:$0xff]  ;;  %v501_v17 = vld [vmem:[#allocation8 + $0x10] sm:$0xff]  ;;  %v1065_v21 = vpack.c.bf16 %v324_v14, %v323_v13  ;;  %s1317_s16 = sshll.u32 %s1427_s10, 4  ;;  %s1318_s16 = int_to_ptr.vmem [resolvable:$false] %s1317_s16 }
  0x8c   : > { %1054 = vmatprep.subr.bf16.mxu0 %v1053_v5  ;;  %v502_v18 = vld [vmem:[#allocation8 + $0x18] sm:$0xff]  ;;  %v1081_v19 = vpack.c.bf16 %v500_v16, %v499_v15  ;;  %v503_v22 = vld [vmem:[#allocation8 + $0x20] sm:$0xff]  ;;  %v504_v23 = vld [vmem:[#allocation8 + $0x28] sm:$0xff]  ;;  %p1315_p3 = pnand %p1314_p0, %p1612_p5  ;;  %s1319_s30 = scalar_lea.vmem %s1318_s16, 4096 }
  0x8d   : > { %v1085_v20 = vpack.c.bf16 %v502_v18, %v501_v17  ;;  %v325_v24 = vld [vmem:[#allocation5 + $0x50] sm:$0xff]  ;;  %v326_v25 = vld [vmem:[#allocation5 + $0x58] sm:$0xff]  ;;  %v1089_v26 = vpack.c.bf16 %v504_v23, %v503_v22  ;;  %v327_v30 = vld [vmem:[#allocation5 + $0x60] sm:$0xff]  ;;  %p1320_p11 = scmp.lt.s32.totalorder %s1728_s23, %s1318_s16  ;;  %p1321_p1 = scmp.lt.s32.totalorder %s1319_s30, %s1313_s13 }
  0x8e   : > { %1082 = vmatprep.subr.bf16.mxu1 %v1081_v19  ;;  %v1069_v27 = vpack.c.bf16 %v326_v25, %v325_v24  ;;  %v505_v28 = vld [vmem:[#allocation8 + $0x30] sm:$0xff]  ;;  %v506_v29 = vld [vmem:[#allocation8 + $0x38] sm:$0xff]  ;;  %v328_v31 = vld [vmem:[#allocation5 + $0x68] sm:$0xff]  ;;  %p1316_p7 = pneg %p1315_p3 }
  0x8f   : > { %1056 = vmatpush3.bf16.msra.mxu0 %v1053_v5  ;;  %1084 = vmatpush3.bf16.msra.mxu1 %v1081_v19  ;;  %v1093_v32 = vpack.c.bf16 %v506_v29, %v505_v28  ;;  %v1073_v33 = vpack.c.bf16 %v328_v31, %v327_v30  ;;  %v507_v34 = vld [vmem:[#allocation8 + $0x40] sm:$0xff]  ;;  %v508_v35 = vld [vmem:[#allocation8 + $0x48] sm:$0xff]  ;;  %v330_v37 = vld [vmem:[#allocation5 + $0x78] sm:$0xff]  ;;  %p1322_p2 = por %p1321_p1, %p1320_p11 }
  0x90   : > { %1058 = vmatprep.subr.bf16.mxu0 %v1057_v8  ;;  %1086 = vmatprep.subr.bf16.mxu1 %v1085_v20  ;;  %v329_v36 = vld [vmem:[#allocation5 + $0x70] sm:$0xff]  ;;  %v1097_v38 = vpack.c.bf16 %v508_v35, %v507_v34  ;;  %v510_v41 = vld [vmem:[#allocation8 + $0x58] sm:$0xff]  ;;  %v511_v43 = vld [vmem:[#allocation8 + $0x60] sm:$0xff] }
  0x91   : > { %v1077_v39 = vpack.c.bf16 %v330_v37, %v329_v36  ;;  %v509_v40 = vld [vmem:[#allocation8 + $0x50] sm:$0xff]  ;;  %v512_v44 = vld [vmem:[#allocation8 + $0x68] sm:$0xff]  ;;  %v303_v49 = vld [vmem:[%s1670_s12 + $0x20] sm:$0xff]  ;;  %p1323_p4 = pnand %p1322_p2, %p1316_p7 }
  0x92   : > { %v1101_v42 = vpack.c.bf16 %v510_v41, %v509_v40  ;;  %v300_v45 = vld [vmem:[%s1670_s12 + $0x8] sm:$0xff]  ;;  %v1105_v46 = vpack.c.bf16 %v512_v44, %v511_v43  ;;  %v301_v47 = vld [vmem:[%s1670_s12 + $0x10] sm:$0xff]  ;;  %v302_v48 = vld [vmem:[%s1670_s12 + $0x18] sm:$0xff] }
  0x93   : > { %1060 = vmatpush3.bf16.msra.mxu0 %v1057_v8  ;;  %1088 = vmatpush3.bf16.msra.mxu1 %v1085_v20  ;;  %v304_v50 = vld [vmem:[%s1670_s12 + $0x28] sm:$0xff]  ;;  %v305_v51 = vld [vmem:[%s1670_s12 + $0x30] sm:$0xff]  ;;  %v306_v52 = vld [vmem:[%s1670_s12 + $0x38] sm:$0xff] }
  0x94   : > { %1062 = vmatprep.subr.bf16.mxu0 %v1061_v12  ;;  %1090 = vmatprep.subr.bf16.mxu1 %v1089_v26  ;;  %v307_v53 = vld [vmem:[%s1670_s12 + $0x40] sm:$0xff]  ;;  %v308_v54 = vld [vmem:[%s1670_s12 + $0x48] sm:$0xff]  ;;  %v309_v55 = vld [vmem:[%s1670_s12 + $0x50] sm:$0xff] }
  0x95   : > { %v310_v56 = vld [vmem:[%s1670_s12 + $0x58] sm:$0xff]  ;;  %v311_v57 = vld [vmem:[%s1670_s12 + $0x60] sm:$0xff]  ;;  %v312_v58 = vld [vmem:[%s1670_s12 + $0x68] sm:$0xff] }
  0x96   : > { %v313_v59 = vld [vmem:[%s1670_s12 + $0x70] sm:$0xff]  ;;  %v314_v60 = vld [vmem:[%s1670_s12 + $0x78] sm:$0xff]  ;;  %v861_v0 = vld [vmem:[#allocation7] ss:$0 sm:$0xff] }
  0x97   : > { %1064 = vmatpush3.bf16.msra.mxu0 %v1061_v12  ;;  %1092 = vmatpush3.bf16.msra.mxu1 %v1089_v26  ;;  %v513_v61 = vld [vmem:[#allocation8 + $0x70] sm:$0xff]  ;;  %v514_v62 = vld [vmem:[#allocation8 + $0x78] sm:$0xff] }
  0x98   : > { %1066 = vmatprep.subr.bf16.mxu0 %v1065_v21  ;;  %1094 = vmatprep.subr.bf16.mxu1 %v1093_v32  ;;  %v1109_v63 = vpack.c.bf16 %v514_v62, %v513_v61 }
  0x9b   : > { %1068 = vmatpush3.bf16.msra.mxu0 %v1065_v21  ;;  %1096 = vmatpush3.bf16.msra.mxu1 %v1093_v32 }
  0x9c   : > { %1070 = vmatprep.subr.bf16.mxu0 %v1069_v27  ;;  %1098 = vmatprep.subr.bf16.mxu1 %v1097_v38 }
  0x9f   : > { %1072 = vmatpush3.bf16.msra.mxu0 %v1069_v27  ;;  %1100 = vmatpush3.bf16.msra.mxu1 %v1097_v38 }
  0xa0   : > { %1074 = vmatprep.subr.bf16.mxu0 %v1073_v33  ;;  %1102 = vmatprep.subr.bf16.mxu1 %v1101_v42 }
  0xa3   : > { %1076 = vmatpush3.bf16.msra.mxu0 %v1073_v33  ;;  %1104 = vmatpush3.bf16.msra.mxu1 %v1101_v42 }
  0xa4   : > { %1078 = vmatprep.subr.bf16.mxu0 %v1077_v39  ;;  %1106 = vmatprep.subr.bf16.mxu1 %v1105_v46 }
  0xa7   : > { %1080 = vmatpush3.bf16.msra.mxu0 %v1077_v39  ;;  %1108 = vmatpush3.bf16.msra.mxu1 %v1105_v46 }
  0xa8   : > { %1110 = vmatprep.subr.bf16.mxu1 %v1109_v63 }
  0xaa   : > { %970 = vmatmul.mubr.f32.vlgmr.msra.gmra.mrb[0].mxu0 %v300_v45 }
  0xab   : > { %972 = vmatprep.mubr.f32.mxu0 %v301_v47  ;;  %1112 = vmatpush3.bf16.msra.mxu1 %v1109_v63 }
  0xae   : > { %973 = vmatmul.mubr.f32.gmra.mrb[2].mxu0 %v302_v48 }
  0xaf   : > { %975 = vmatprep.mubr.f32.mxu0 %v303_v49 }
  0xb2   : > { %976 = vmatmul.mubr.f32.gmra.mrb[4].mxu0 %v304_v50 }
  0xb3   : > { %978 = vmatprep.mubr.f32.mxu0 %v305_v51 }
  0xb6   : > { %979 = vmatmul.mubr.f32.gmra.mrb[6].mxu0 %v306_v52 }
  0xb7   : > { %981 = vmatprep.mubr.f32.mxu0 %v307_v53 }
  0xba   : > { %982 = vmatmul.mubr.f32.gmra.mrb[8].mxu0 %v308_v54 }
  0xbb   : > { %984 = vmatprep.mubr.f32.mxu0 %v309_v55 }
  0xbe   : > { %985 = vmatmul.mubr.f32.gmra.mrb[10].mxu0 %v310_v56 }
  0xbf   : > { %987 = vmatprep.mubr.f32.mxu0 %v311_v57 }
  0xc2   : > { %988 = vmatmul.mubr.f32.gmra.mrb[12].mxu0 %v312_v58 }
  0xc3   : > { %990 = vmatprep.mubr.f32.mxu0 %v313_v59 }
  0xc6   : > { %991 = vmatmul.mubr.f32.gmra.mrb[14].mxu0 %v314_v60 }
 0x17d   : > { %v971_v1 = vpop.f32.mrb[0].mxu0 }
 0x17e   : > { %v410_v2 = vadd.f32 %v971_v1, %v861_v0  ;;  %v404_v3 = vpop.f32.mrb[1].mxu0 }
 0x17f   : > { %v405_v4 = vadd.f32 %v861_v0, %v404_v3 }
 0x180   : > { %484 = vst [vmem:[%s1701_s24 + $0x8] sm:$0xff] %v410_v2 }
 0x181   : > { %483 = vst [vmem:[%s1701_s24] sm:$0xff] %v405_v4  ;;  %v974_v5 = vpop.f32.mrb[2].mxu0  ;;  %1025 = vmatprep.mubr.f32.mxu1 %v405_v4 }
 0x182   : > { %v420_v6 = vadd.f32 %v974_v5, %v861_v0  ;;  %v414_v7 = vpop.f32.mrb[3].mxu0  ;;  %1026 = vmatmul.mubr.f32.vlgmr.msra.gmra.mrb[0].mxu1 %v410_v2 }
 0x183   : > { %v415_v8 = vadd.f32 %v861_v0, %v414_v7 }
 0x184   : > { %486 = vst [vmem:[%s1701_s24 + $0x18] sm:$0xff] %v420_v6 }
 0x185   : > { %485 = vst [vmem:[%s1701_s24 + $0x10] sm:$0xff] %v415_v8  ;;  %v977_v9 = vpop.f32.mrb[4].mxu0  ;;  %1028 = vmatprep.mubr.f32.mxu1 %v415_v8 }
 0x186   : > { %v430_v10 = vadd.f32 %v977_v9, %v861_v0  ;;  %v424_v11 = vpop.f32.mrb[5].mxu0  ;;  %1029 = vmatmul.mubr.f32.gmra.mrb[2].mxu1 %v420_v6 }
 0x187   : > { %v425_v12 = vadd.f32 %v861_v0, %v424_v11 }
 0x188   : > { %488 = vst [vmem:[%s1701_s24 + $0x28] sm:$0xff] %v430_v10 }
 0x189   : > { %487 = vst [vmem:[%s1701_s24 + $0x20] sm:$0xff] %v425_v12  ;;  %v980_v13 = vpop.f32.mrb[6].mxu0  ;;  %1031 = vmatprep.mubr.f32.mxu1 %v425_v12 }
 0x18a   : > { %v440_v14 = vadd.f32 %v980_v13, %v861_v0  ;;  %v434_v15 = vpop.f32.mrb[7].mxu0  ;;  %1032 = vmatmul.mubr.f32.gmra.mrb[4].mxu1 %v430_v10 }
 0x18b   : > { %v435_v16 = vadd.f32 %v861_v0, %v434_v15 }
 0x18c   : > { %490 = vst [vmem:[%s1701_s24 + $0x38] sm:$0xff] %v440_v14 }
 0x18d   : > { %489 = vst [vmem:[%s1701_s24 + $0x30] sm:$0xff] %v435_v16  ;;  %v983_v17 = vpop.f32.mrb[8].mxu0  ;;  %1034 = vmatprep.mubr.f32.mxu1 %v435_v16 }
 0x18e   : > { %v450_v18 = vadd.f32 %v983_v17, %v861_v0  ;;  %v444_v19 = vpop.f32.mrb[9].mxu0  ;;  %1035 = vmatmul.mubr.f32.gmra.mrb[6].mxu1 %v440_v14 }
 0x18f   : > { %v445_v20 = vadd.f32 %v861_v0, %v444_v19 }
 0x190   : > { %492 = vst [vmem:[%s1701_s24 + $0x48] sm:$0xff] %v450_v18 }
 0x191   : > { %491 = vst [vmem:[%s1701_s24 + $0x40] sm:$0xff] %v445_v20  ;;  %v986_v21 = vpop.f32.mrb[10].mxu0  ;;  %1037 = vmatprep.mubr.f32.mxu1 %v445_v20 }
 0x192   : > { %v460_v22 = vadd.f32 %v986_v21, %v861_v0  ;;  %v454_v23 = vpop.f32.mrb[11].mxu0  ;;  %1038 = vmatmul.mubr.f32.gmra.mrb[8].mxu1 %v450_v18 }
 0x193   : > { %v455_v24 = vadd.f32 %v861_v0, %v454_v23 }
 0x194   : > { %494 = vst [vmem:[%s1701_s24 + $0x58] sm:$0xff] %v460_v22 }
 0x195   : > { %493 = vst [vmem:[%s1701_s24 + $0x50] sm:$0xff] %v455_v24  ;;  %v989_v25 = vpop.f32.mrb[12].mxu0  ;;  %1040 = vmatprep.mubr.f32.mxu1 %v455_v24 }
 0x196   : > { %v470_v26 = vadd.f32 %v989_v25, %v861_v0  ;;  %v464_v27 = vpop.f32.mrb[13].mxu0  ;;  %1041 = vmatmul.mubr.f32.gmra.mrb[10].mxu1 %v460_v22 }
 0x197   : > { %v465_v28 = vadd.f32 %v861_v0, %v464_v27 }
 0x198   : > { %496 = vst [vmem:[%s1701_s24 + $0x68] sm:$0xff] %v470_v26 }
 0x199   : > { %495 = vst [vmem:[%s1701_s24 + $0x60] sm:$0xff] %v465_v28  ;;  %v992_v29 = vpop.f32.mrb[14].mxu0  ;;  %1043 = vmatprep.mubr.f32.mxu1 %v465_v28 }
 0x19a   : > { %v480_v30 = vadd.f32 %v992_v29, %v861_v0  ;;  %v474_v31 = vpop.f32.mrb[15].mxu0  ;;  %1044 = vmatmul.mubr.f32.gmra.mrb[12].mxu1 %v470_v26 }
 0x19b   : > { %v475_v32 = vadd.f32 %v861_v0, %v474_v31 }
 0x19c   : > { %498 = vst [vmem:[%s1701_s24 + $0x78] sm:$0xff] %v480_v30 }
 0x19d   : > { %497 = vst [vmem:[%s1701_s24 + $0x70] sm:$0xff] %v475_v32  ;;  %1046 = vmatprep.mubr.f32.mxu1 %v475_v32 }
 0x19e   : > { %1047 = vmatmul.mubr.f32.gmra.mrb[14].mxu1 %v480_v30 }
 0x19f   : > { %1326 = shalt.err (!%p1323_p4)
}
 0x1a0   : > { %s1327_s11 = scalar_lea.hbm %s1726_s28, 2048  ;;  %s1331_s24 = scalar_lea.hbm %s1834_s4, 8192 }
 0x1a1   : > { %p1328_p9 = scmp.ne.s32.totalorder %s1726_s28, %s1327_s11  ;;  %p1332_p8 = scmp.lt.u32.totalorder %s1726_s28, %s1834_s4 }
 0x1a2   : > { %p1333_p12 = scmp.lt.u32.totalorder %s1331_s24, %s1327_s11  ;;  %p1335_p0 = scmp.lt.u32.totalorder %s1327_s11, %s1726_s28 }
 0x1a3   : > { %p1329_p13 = pnand %p1328_p9, %p1612_p5 }
 0x1a4   : > { %p1334_p6 = por %p1333_p12, %p1332_p8 }
 0x1a5   : > { %p1330_p10 = pneg %p1329_p13 }
 0x1a6   : > { %p1336_p3 = por %p1335_p0, %p1334_p6 }
 0x1a8   : > { %p1337_p7 = pnand %p1336_p3, %p1330_p10 }
 0x1aa   : > { %1340 = shalt.err (!%p1337_p7)
}
 0x1ab   : > { %s1428_s13 = smov 128   ;;  %s1429_s10 = smov 8  }
 0x1ac   : > { %1127 = dma.vmem_to_hbm [thread:$0]  (%p1612_p5), %s1728_s23, 2048, %s1726_s28, %s677_s17, %s1428_s13, %s1428_s13, %s1429_s10  }
 0x1ad   : > { %s1758_s16 = scalar_lea.vmem [#allocation11], %s1666_s8  ;;  %s1780_s17 = scalar_lea.hbm %s1835_s5, %s871_s26 }
 0x1ae   : > { %s711_s8 = sshll.u32 %s1758_s16, 4  ;;  %s682_s30 = scalar_lea.sflag [#allocation12], %s1663_s29  ;;  %s1782_s8 = int_to_ptr.vmem [resolvable:$true] %s711_s8 }
 0x1af   : > { %s1341_s11 = scalar_lea.vmem %s1782_s8, 2048  ;;  %s1430_s22 = smov [#allocation11]  }
 0x1b0   : > { %p1342_p11 = scmp.ne.s32.totalorder %s1782_s8, %s1341_s11  ;;  %s1345_s6 = sshll.u32 %s1430_s22, 4  ;;  %s1346_s6 = int_to_ptr.vmem [resolvable:$false] %s1345_s6 }
 0x1b1   : > { %s1347_s12 = scalar_lea.vmem %s1346_s6, 4096  ;;  %p1348_p4 = scmp.lt.s32.totalorder %s1782_s8, %s1346_s6 }
 0x1b2   : > { %p1343_p1 = pnand %p1342_p11, %p1612_p5  ;;  %p1349_p9 = scmp.lt.s32.totalorder %s1347_s12, %s1341_s11 }
 0x1b4   : > { %p1344_p2 = pneg %p1343_p1  ;;  %p1350_p13 = por %p1349_p9, %p1348_p4 }
 0x1b6   : > { %p1351_p10 = pnand %p1350_p13, %p1344_p2 }
 0x255   : > { %v1027_v33 = vpop.f32.mrb[0].mxu1 }
 0x256   : > { %661 = vst [vmem:[%s1758_s16 + $0x8] sm:$0xff] %v1027_v33  ;;  %v581_v34 = vpop.f32.mrb[1].mxu1 }
 0x257   : > { %660 = vst [vmem:[%s1758_s16] sm:$0xff] %v581_v34 }
 0x259   : > { %v1030_v35 = vpop.f32.mrb[2].mxu1 }
 0x25a   : > { %663 = vst [vmem:[%s1758_s16 + $0x18] sm:$0xff] %v1030_v35  ;;  %v591_v36 = vpop.f32.mrb[3].mxu1 }
 0x25b   : > { %662 = vst [vmem:[%s1758_s16 + $0x10] sm:$0xff] %v591_v36 }
 0x25d   : > { %v1033_v37 = vpop.f32.mrb[4].mxu1 }
 0x25e   : > { %665 = vst [vmem:[%s1758_s16 + $0x28] sm:$0xff] %v1033_v37  ;;  %v601_v38 = vpop.f32.mrb[5].mxu1 }
 0x25f   : > { %664 = vst [vmem:[%s1758_s16 + $0x20] sm:$0xff] %v601_v38 }
 0x261   : > { %v1036_v39 = vpop.f32.mrb[6].mxu1 }
 0x262   : > { %667 = vst [vmem:[%s1758_s16 + $0x38] sm:$0xff] %v1036_v39  ;;  %v611_v40 = vpop.f32.mrb[7].mxu1 }
 0x263   : > { %666 = vst [vmem:[%s1758_s16 + $0x30] sm:$0xff] %v611_v40 }
 0x265   : > { %v1039_v41 = vpop.f32.mrb[8].mxu1 }
 0x266   : > { %669 = vst [vmem:[%s1758_s16 + $0x48] sm:$0xff] %v1039_v41  ;;  %v621_v42 = vpop.f32.mrb[9].mxu1 }
 0x267   : > { %668 = vst [vmem:[%s1758_s16 + $0x40] sm:$0xff] %v621_v42 }
 0x269   : > { %v1042_v43 = vpop.f32.mrb[10].mxu1 }
 0x26a   : > { %671 = vst [vmem:[%s1758_s16 + $0x58] sm:$0xff] %v1042_v43  ;;  %v631_v44 = vpop.f32.mrb[11].mxu1 }
 0x26b   : > { %670 = vst [vmem:[%s1758_s16 + $0x50] sm:$0xff] %v631_v44 }
 0x26d   : > { %v1045_v45 = vpop.f32.mrb[12].mxu1 }
 0x26e   : > { %673 = vst [vmem:[%s1758_s16 + $0x68] sm:$0xff] %v1045_v45  ;;  %v641_v46 = vpop.f32.mrb[13].mxu1 }
 0x26f   : > { %672 = vst [vmem:[%s1758_s16 + $0x60] sm:$0xff] %v641_v46 }
 0x271   : > { %v1048_v47 = vpop.f32.mrb[14].mxu1 }
 0x272   : > { %675 = vst [vmem:[%s1758_s16 + $0x78] sm:$0xff] %v1048_v47  ;;  %v651_v48 = vpop.f32.mrb[15].mxu1 }
 0x273   : > { %674 = vst [vmem:[%s1758_s16 + $0x70] sm:$0xff] %v651_v48 }
 0x274   : > { %1354 = shalt.err (!%p1351_p10)
}
 0x275   : > { %s1355_s26 = scalar_lea.hbm %s1780_s17, 2048  ;;  %s1359_s15 = scalar_lea.hbm %s1835_s5, 8192 }
 0x276   : > { %p1356_p8 = scmp.ne.s32.totalorder %s1780_s17, %s1355_s26  ;;  %p1360_p0 = scmp.lt.u32.totalorder %s1780_s17, %s1835_s5 }
 0x277   : > { %p1361_p3 = scmp.lt.u32.totalorder %s1359_s15, %s1355_s26  ;;  %p1363_p11 = scmp.lt.u32.totalorder %s1355_s26, %s1780_s17 }
 0x278   : > { %p1357_p12 = pnand %p1356_p8, %p1612_p5 }
 0x279   : > { %p1362_p7 = por %p1361_p3, %p1360_p0 }
 0x27a   : > { %p1358_p6 = pneg %p1357_p12 }
 0x27b   : > { %p1364_p1 = por %p1363_p11, %p1362_p7 }
 0x27d   : > { %p1365_p2 = pnand %p1364_p1, %p1358_p6 }
 0x27f   : > { %1368 = shalt.err (!%p1365_p2)
}
 0x280   : > { %1128 = dma.vmem_to_hbm [thread:$0]  (%p1612_p5), %s1782_s8, 2048, %s1780_s17, %s682_s30, %s1428_s13, %s1428_s13, %s1429_s10  }
 0x281 PF: > { %p1159_p4 = scmp.ge.s32.totalorder %s1419_s21, 2  ;;  %s726_s28 = sand.u32 1, %s1407_s18  }
 0x282   : > { %p1853_p9 = scmp.ne.s32.totalorder %s1840_s25, 0  ;;  %s727_s11 = scalar_lea.sflag [#allocation4], %s726_s28 }
 0x284   : > { %p1146_p13 = pnand %p1159_p4, %p1853_p9 }
 0x286   : > { %1398 = dma.done.wait (!%p1146_p13), %s727_s11, 2048  }
 0x287   : > { %1400 = vsyncadd (!%p1146_p13), %s727_s11, 4294965248  ;;  %s736_s9 = scalar_lea.sflag [#allocation12], %s726_s28 }
 0x288   : > { %1402 = dma.done.wait (!%p1146_p13), %s736_s9, 2048  }
 0x289   : > { %1404 = vsyncadd (!%p1146_p13), %s736_s9, 4294965248  ;;  %p24_p5 = scmp.ge.s32.totalorder %s1598_s14, 6   ;;  %s1854_s18 = smov %s1411_s19 }
 0x28a   : > { %s1855_s19 = smov %s1415_s20  ;;  %s1856_s20 = smov %s1608_s7 }
 0x28b   : > { %s1857_s21 = smov %s1598_s14  ;;  %26 = sbr.rel (!%p24_p5) target bundleno = 9 (0x9), region = 110 }
 0x292   :  { %741 = vsyncpa [#allocation3], 1 }
 0x293   :  { %743 = vsyncpa [#allocation3 + $0x1], 1 }
 0x294   :  { %744 = vsyncpa [#allocation6], 1 }
 0x295   :  { %745 = vsyncpa [#allocation9], 1 }
 0x296   :  { %746 = vsyncpa [#allocation4], 1 }
 0x297   :  { %748 = vsyncpa [#allocation4 + $0x1], 1 }
 0x298   :  { %749 = vsyncpa [#allocation12], 1 }
 0x299   :  { %751 = vsyncpa [#allocation12 + $0x1], 1 }

</bundles_post_ra>
